<compile_context>
chip_gen: v7x
topology: tpu7x:2x2x1
jax: 0.10.0
libtpu: 0.0.40
codegen_flags: <defaults>
</compile_context>

<pallas_src>
import functools

import jax
import jax.numpy as jnp
from jax import lax
from jax.experimental import pallas as pl
from jax.experimental.pallas import tpu as pltpu


def _round_up(x, m):
    return ((x + m - 1) // m) * m


def _pad_to(a, shape):
    pads = [(0, s - d) for d, s in zip(a.shape, shape)]
    return jnp.pad(a, pads)


def convnext_kernel(xp_hbm, w1_hbm, w2_hbm,
                    dww_ref, dwb_ref, lnw_ref, lnb_ref, b1_ref, b2_ref,
                    gamma_ref, o_ref,
                    xbuf, w1_vmem, w2_vmem, sems,
                    *, kernel_size, dilation, halo, tile_t, win_t, true_c, eps):
    n = pl.program_id(0)          # batch row
    j = pl.program_id(1)          # time tile within the row
    n_t = pl.num_programs(1)
    slot = lax.rem(j, 2)

    def xp_copy(tj, tslot):
        start = pl.multiple_of(tj * tile_t, 8)      # tile_t is a multiple of 8
        return pltpu.make_async_copy(
            xp_hbm.at[n, pl.ds(start, win_t), :], xbuf.at[tslot], sems.at[tslot])

    # First tile of every batch row: prime the input window pipeline and load
    # the big pointwise weights once into single-copy VMEM scratch.  (Guarded
    # on j == 0, not (n, j) == (0, 0), so it stays correct if the "parallel"
    # batch axis is sharded across TensorCores.)
    @pl.when(j == 0)
    def _():
        xp_copy(j, slot).start()
        pltpu.make_async_copy(w1_hbm, w1_vmem, sems.at[2]).start()
        pltpu.make_async_copy(w2_hbm, w2_vmem, sems.at[3]).start()
        pltpu.make_async_copy(w1_hbm, w1_vmem, sems.at[2]).wait()
        pltpu.make_async_copy(w2_hbm, w2_vmem, sems.at[3]).wait()

    # Wait for this tile's haloed window (prefetched by the previous step, or
    # primed above for j == 0).
    xp_copy(j, slot).wait()

    # Prefetch the next window of this row into the other buffer; it overlaps
    # with the compute below.
    @pl.when(j + 1 < n_t)
    def _():
        xp_copy(j + 1, 1 - slot).start()

    f32 = jnp.float32
    xw = xbuf[slot].astype(f32)                      # (win_t, Cpad)

    # ---- depthwise Conv1d (groups=C): per-channel K-tap (dilated) FIR -------
    dww = dww_ref[...].astype(f32)                   # (K, Cpad)
    y = dwb_ref[...].astype(f32)                     # (1, Cpad) -> broadcast
    for k in range(kernel_size):                     # static, unrolled
        y = y + xw[k * dilation:k * dilation + tile_t, :] * dww[k:k + 1, :]

    # ---- LayerNorm over the channel axis (biased variance, true C) ----------
    c_pad = y.shape[-1]
    inv_c = f32(1.0 / true_c)
    u = jnp.sum(y, axis=-1, keepdims=True) * inv_c   # padded lanes of y are 0
    d = y - u
    if c_pad != true_c:                              # mask pad lanes out of var
        lane = lax.broadcasted_iota(jnp.int32, (1, c_pad), 1)
        d = jnp.where(lane < true_c, d, 0.0)
    s = jnp.sum(d * d, axis=-1, keepdims=True) * inv_c
    yn = d * lax.rsqrt(s + f32(eps))
    yn = yn * lnw_ref[...].astype(f32) + lnb_ref[...].astype(f32)

    # ---- pointwise MLP: bf16 MXU matmuls, f32 accumulation, exact GELU ------
    h = jnp.dot(yn.astype(jnp.bfloat16), w1_vmem[...],
                preferred_element_type=f32) + b1_ref[...].astype(f32)
    h = 0.5 * h * (1.0 + lax.erf(h * f32(0.7071067811865476)))  # nn.GELU() exact
    out = jnp.dot(h.astype(jnp.bfloat16), w2_vmem[...],
                  preferred_element_type=f32) + b2_ref[...].astype(f32)

    # ---- layer scale + residual (residual = centre of the input window) -----
    out = out * gamma_ref[...].astype(f32) + xw[halo:halo + tile_t, :]
    o_ref[...] = out.astype(o_ref.dtype)


def convnext_block(x_nct, params, *, kernel_size=7, dilation=1, eps=1e-6,
                   tile_t=256, apply_residual=True):
    """ConvNeXtBlock forward. x_nct: (N, C, T) like the PyTorch module."""
    assert apply_residual, "kernel fuses the residual add"
    assert kernel_size % 2 == 1, "PyTorch 'same' padding formula needs odd K"
    N, C, T = x_nct.shape
    K = kernel_size
    halo = dilation * (K - 1) // 2

    # lane-dense channel / hidden dims (multiples of 128)
    c_pad = _round_up(max(C, 128), 128)
    H = params["w1"].shape[1]
    h_pad = _round_up(max(H, 128), 128)

    # time tiling (+ conv halo): bounds VMEM, enables pipelined DMA
    t_tile = max(8, min(_round_up(tile_t, 8), _round_up(T, 8)))
    n_t = -(-T // t_tile)
    win_t = _round_up(t_tile + 2 * halo, 8)
    t_out = n_t * t_tile                          # padded output length
    t_padded = (n_t - 1) * t_tile + win_t         # padded input length

    # channels-last with zero-padded halo / tail / lanes (stays in HBM)
    # TODO(synk): fold this pad+transpose into the producing layer (keep the
    # model channels-last end-to-end) to avoid the extra HBM round-trip.
    x_ntc = jnp.transpose(x_nct, (0, 2, 1))
    xp = jnp.pad(x_ntc, ((0, 0), (halo, t_padded - halo - T), (0, c_pad - C)))

    f32 = jnp.float32
    dw_w = _pad_to(params["dw_w"].astype(f32), (K, c_pad))
    dw_b = _pad_to(params["dw_b"].astype(f32), (1, c_pad))
    ln_w = _pad_to(params["ln_w"].astype(f32), (1, c_pad))
    ln_b = _pad_to(params["ln_b"].astype(f32), (1, c_pad))
    w1 = _pad_to(params["w1"], (c_pad, h_pad)).astype(jnp.bfloat16)
    b1 = _pad_to(params["b1"].astype(f32), (1, h_pad))
    w2 = _pad_to(params["w2"], (h_pad, c_pad)).astype(jnp.bfloat16)
    b2 = _pad_to(params["b2"].astype(f32), (1, c_pad))
    gamma = _pad_to(params["gamma"].astype(f32), (1, c_pad))

    kern = functools.partial(
        convnext_kernel, kernel_size=K, dilation=dilation, halo=halo,
        tile_t=t_tile, win_t=win_t, true_c=C, eps=eps)

    itemsize = jnp.dtype(x_nct.dtype).itemsize
    # Rough per-step VMEM footprint; explicit limit keeps us honest on v7x's
    # smaller (64 MiB physical) VMEM while allowing big tiles on v5e/v6e.
    vmem_est = (2 * win_t * c_pad * itemsize          # double-buffered input window
                + 2 * t_tile * c_pad * itemsize       # double-buffered output tile
                + 2 * c_pad * h_pad * 2               # bf16 w1+w2 (single copy)
                + t_tile * h_pad * 4                  # GELU intermediate
                + 8 * t_tile * c_pad * 4              # f32 temporaries
                + 4 * (K + 6) * c_pad * 4)            # small params (auto dbuf)
    vmem_limit = int(min(max(2 * vmem_est, 16 * 2**20), 48 * 2**20))

    cost = pl.CostEstimate(
        flops=int(4 * N * t_out * c_pad * h_pad + 2 * N * t_out * c_pad * (K + 8)),
        transcendentals=int(N * t_out * h_pad),
        bytes_accessed=int(xp.size * itemsize + N * t_out * c_pad * itemsize
                           + N * 2 * c_pad * h_pad * 2 + 8 * c_pad * 4))

    out_ntc = pl.pallas_call(
        kern,
        out_shape=jax.ShapeDtypeStruct((N, t_out, c_pad), x_nct.dtype),
        grid_spec=pltpu.PrefetchScalarGridSpec(
            num_scalar_prefetch=0,
            grid=(N, n_t),
            in_specs=[
                pl.BlockSpec(memory_space=pl.ANY),               # padded x (HBM)
                pl.BlockSpec(memory_space=pl.ANY),               # w1 (HBM, bf16)
                pl.BlockSpec(memory_space=pl.ANY),               # w2 (HBM, bf16)
                pl.BlockSpec((K, c_pad), lambda n, j: (0, 0)),   # dwconv weight
                pl.BlockSpec((1, c_pad), lambda n, j: (0, 0)),   # dwconv bias
                pl.BlockSpec((1, c_pad), lambda n, j: (0, 0)),   # LN weight
                pl.BlockSpec((1, c_pad), lambda n, j: (0, 0)),   # LN bias
                pl.BlockSpec((1, h_pad), lambda n, j: (0, 0)),   # pwconv1 bias
                pl.BlockSpec((1, c_pad), lambda n, j: (0, 0)),   # pwconv2 bias
                pl.BlockSpec((1, c_pad), lambda n, j: (0, 0)),   # gamma
            ],
            out_specs=pl.BlockSpec((None, t_tile, c_pad), lambda n, j: (n, j, 0)),
            scratch_shapes=[
                pltpu.VMEM((2, win_t, c_pad), x_nct.dtype),      # input window dbuf
                pltpu.VMEM((c_pad, h_pad), jnp.bfloat16),        # resident w1
                pltpu.VMEM((h_pad, c_pad), jnp.bfloat16),        # resident w2
                pltpu.SemaphoreType.DMA((4,)),                   # 0/1: window, 2/3: weights
            ]),
        compiler_params=pltpu.CompilerParams(
            # T axis carries the manual cross-step halo prefetch -> "arbitrary".
            # Batch axis is "parallel" so megacore/v7x can shard over samples.
            dimension_semantics=("parallel", "arbitrary"),
            vmem_limit_bytes=vmem_limit),
        cost_estimate=cost,
    )(xp, w1, w2, dw_w, dw_b, ln_w, ln_b, b1, b2, gamma)

    return jnp.transpose(out_ntc[:, :T, :C], (0, 2, 1))          # back to (N, C, T)


def convnext_ref(x_nct, params, *, kernel_size=7, dilation=1, eps=1e-6,
                 bf16_matmul=False):
    """Pure-JAX reference mirroring the PyTorch forward (optionally with the
    same bf16-matmul / f32-accumulation scheme as the kernel)."""
    N, C, T = x_nct.shape
    halo = dilation * (kernel_size - 1) // 2
    x_ntc = jnp.transpose(x_nct, (0, 2, 1)).astype(jnp.float32)
    xp = jnp.pad(x_ntc, ((0, 0), (halo, halo), (0, 0)))
    y = jnp.zeros_like(x_ntc)
    for k in range(kernel_size):
        y = y + xp[:, k * dilation:k * dilation + T, :] * params["dw_w"][k][None, None, :]
    y = y + params["dw_b"]
    u = jnp.mean(y, axis=-1, keepdims=True)
    s = jnp.mean((y - u) ** 2, axis=-1, keepdims=True)
    yn = (y - u) / jnp.sqrt(s + eps) * params["ln_w"] + params["ln_b"]
    w1, w2 = params["w1"], params["w2"]
    if bf16_matmul:
        h = jnp.dot(yn.astype(jnp.bfloat16), w1.astype(jnp.bfloat16),
                    preferred_element_type=jnp.float32) + params["b1"]
    else:
        h = yn @ w1 + params["b1"]
    h = 0.5 * h * (1.0 + jax.lax.erf(h * jnp.float32(0.7071067811865476)))
    if bf16_matmul:
        out = jnp.dot(h.astype(jnp.bfloat16), w2.astype(jnp.bfloat16),
                      preferred_element_type=jnp.float32) + params["b2"]
    else:
        out = h @ w2 + params["b2"]
    out = out * params["gamma"]
    return x_nct + jnp.transpose(out, (0, 2, 1)).astype(x_nct.dtype)


if __name__ == "__main__":
    N, dim, T = 2, 32, 40
    K, mlp_ratio = 7, 4.0
    H = int(mlp_ratio * dim)

    key = jax.random.PRNGKey(0)
    ks = jax.random.split(key, 8)
    params = {
        # dw_w is the PyTorch Conv1d depthwise weight (dim, 1, K) stored as (K, dim)
        "dw_w": jax.random.normal(ks[0], (K, dim), jnp.float32) * 0.1,
        "dw_b": jax.random.normal(ks[1], (1, dim), jnp.float32) * 0.1,
        "ln_w": 1.0 + 0.1 * jax.random.normal(ks[2], (1, dim), jnp.float32),
        "ln_b": 0.1 * jax.random.normal(ks[3], (1, dim), jnp.float32),
        "w1": jax.random.normal(ks[4], (dim, H), jnp.float32) * 0.05,
        "b1": jax.random.normal(ks[5], (1, H), jnp.float32) * 0.05,
        "w2": jax.random.normal(ks[6], (H, dim), jnp.float32) * 0.05,
        "b2": jax.random.normal(ks[7], (1, dim), jnp.float32) * 0.05,
        # module default is 1e-6; use a larger scale so the check is non-trivial
        "gamma": jnp.full((1, dim), 0.5, jnp.float32),
    }
    x = jax.random.normal(jax.random.PRNGKey(1), (N, dim, T), jnp.float32)

    # (dilation, tile_t): exercise multi-tile + halo DMA, dilation>1, single tile
    for dil, tt in ((1, 16), (2, 16), (1, 256)):
        out = jax.block_until_ready(
            convnext_block(x, params, kernel_size=K, dilation=dil, tile_t=tt))
        assert out.shape == (N, dim, T)
        ref_bf16 = convnext_ref(x, params, kernel_size=K, dilation=dil,
                                bf16_matmul=True)
        ref_f32 = convnext_ref(x, params, kernel_size=K, dilation=dil,
                               bf16_matmul=False)
        assert jnp.allclose(out, ref_bf16, rtol=1e-3, atol=1e-3), \
            f"mismatch vs bf16-matmul reference (dil={dil}, tile_t={tt})"
        assert jnp.allclose(out, ref_f32, rtol=2e-2, atol=2e-2), \
            f"mismatch vs exact f32 reference (dil={dil}, tile_t={tt})"

    print("KERNEL_OK")
</pallas_src>

<mosaic_0001>
module attributes {stable_mosaic.version = 11 : i64} {
  func.func @convnext_kernel(%arg0: i32, %arg1: i32, %arg2: memref<2x56x128xf32, #tpu.memory_space<any>>, %arg3: memref<128x128xbf16, #tpu.memory_space<any>>, %arg4: memref<128x128xbf16, #tpu.memory_space<any>>, %arg5: memref<7x128xf32, #tpu.memory_space<vmem>>, %arg6: memref<1x128xf32, #tpu.memory_space<vmem>>, %arg7: memref<1x128xf32, #tpu.memory_space<vmem>>, %arg8: memref<1x128xf32, #tpu.memory_space<vmem>>, %arg9: memref<1x128xf32, #tpu.memory_space<vmem>>, %arg10: memref<1x128xf32, #tpu.memory_space<vmem>>, %arg11: memref<1x128xf32, #tpu.memory_space<vmem>>, %arg12: memref<1x16x128xf32, #tpu.memory_space<vmem>>, %arg13: memref<2x24x128xf32, #tpu.memory_space<vmem>>, %arg14: memref<128x128xbf16, #tpu.memory_space<vmem>>, %arg15: memref<128x128xbf16, #tpu.memory_space<vmem>>, %arg16: memref<4x!tpu.dma_semaphore, #tpu.memory_space<semaphore_mem>>) attributes {dimension_semantics = [#tpu.dimension_semantics<parallel>, #tpu.dimension_semantics<arbitrary>], iteration_bounds = array<i64: 2, 3>, scalar_prefetch = 0 : i64, scratch_operands = 4 : i64, tpu.core_type = #tpu.core_type<tc>, window_params = [{}, {}, {}, {pipeline_mode = #tpu.pipeline_mode<synchronous>, transform_indices = @transform_3, window_bounds = array<i64: 7, 128>}, {pipeline_mode = #tpu.pipeline_mode<synchronous>, transform_indices = @transform_4, window_bounds = array<i64: 1, 128>}, {pipeline_mode = #tpu.pipeline_mode<synchronous>, transform_indices = @transform_5, window_bounds = array<i64: 1, 128>}, {pipeline_mode = #tpu.pipeline_mode<synchronous>, transform_indices = @transform_6, window_bounds = array<i64: 1, 128>}, {pipeline_mode = #tpu.pipeline_mode<synchronous>, transform_indices = @transform_7, window_bounds = array<i64: 1, 128>}, {pipeline_mode = #tpu.pipeline_mode<synchronous>, transform_indices = @transform_8, window_bounds = array<i64: 1, 128>}, {pipeline_mode = #tpu.pipeline_mode<synchronous>, transform_indices = @transform_9, window_bounds = array<i64: 1, 128>}, {transform_indices = @transform_10, window_bounds = array<i64: 1, 16, 128>}]} {
    %c2_i32 = arith.constant 2 : i32
    %0 = arith.remsi %arg1, %c2_i32 : i32
    %c0_i32 = arith.constant 0 : i32
    %1 = arith.cmpi eq, %arg1, %c0_i32 : i32
    %2 = arith.extui %1 : i1 to i32
    %c0_i32_0 = arith.constant 0 : i32
    %3 = arith.cmpi ne, %2, %c0_i32_0 : i32
    scf.if %3 {
      %c16_i32_37 = arith.constant 16 : i32
      %114 = arith.muli %arg1, %c16_i32_37 : i32
      %115 = tpu.assume_multiple %114, 8 : i32
      %c0_i32_38 = arith.constant 0 : i32
      %116 = tpu.memref_slice %arg2[%arg0, %115, %c0_i32_38] : memref<2x56x128xf32, #tpu.memory_space<any>> -> memref<1x24x128xf32, #tpu.memory_space<any>>
      %117 = tpu.memref_squeeze %116 : memref<1x24x128xf32, #tpu.memory_space<any>> -> memref<24x128xf32, #tpu.memory_space<any>>
      %c0_i32_39 = arith.constant 0 : i32
      %c0_i32_40 = arith.constant 0 : i32
      %118 = tpu.memref_slice %arg13[%0, %c0_i32_39, %c0_i32_40] : memref<2x24x128xf32, #tpu.memory_space<vmem>> -> memref<1x24x128xf32, #tpu.memory_space<vmem>>
      %119 = tpu.memref_squeeze %118 : memref<1x24x128xf32, #tpu.memory_space<vmem>> -> memref<24x128xf32, #tpu.memory_space<vmem>>
      %120 = tpu.memref_slice %arg16[%0] : memref<4x!tpu.dma_semaphore, #tpu.memory_space<semaphore_mem>> -> memref<1x!tpu.dma_semaphore, #tpu.memory_space<semaphore_mem>>
      %121 = tpu.memref_squeeze %120 : memref<1x!tpu.dma_semaphore, #tpu.memory_space<semaphore_mem>> -> memref<!tpu.dma_semaphore, #tpu.memory_space<semaphore_mem>>
      tpu.enqueue_dma source(%117 : memref<24x128xf32, #tpu.memory_space<any>>) target(%119 : memref<24x128xf32, #tpu.memory_space<vmem>>) target_semaphore(%121 : memref<!tpu.dma_semaphore, #tpu.memory_space<semaphore_mem>>)
      %c2_i32_41 = arith.constant 2 : i32
      %122 = tpu.memref_slice %arg16[%c2_i32_41] : memref<4x!tpu.dma_semaphore, #tpu.memory_space<semaphore_mem>> -> memref<1x!tpu.dma_semaphore, #tpu.memory_space<semaphore_mem>>
      %123 = tpu.memref_squeeze %122 : memref<1x!tpu.dma_semaphore, #tpu.memory_space<semaphore_mem>> -> memref<!tpu.dma_semaphore, #tpu.memory_space<semaphore_mem>>
      tpu.enqueue_dma source(%arg3 : memref<128x128xbf16, #tpu.memory_space<any>>) target(%arg14 : memref<128x128xbf16, #tpu.memory_space<vmem>>) target_semaphore(%123 : memref<!tpu.dma_semaphore, #tpu.memory_space<semaphore_mem>>)
      %c3_i32_42 = arith.constant 3 : i32
      %124 = tpu.memref_slice %arg16[%c3_i32_42] : memref<4x!tpu.dma_semaphore, #tpu.memory_space<semaphore_mem>> -> memref<1x!tpu.dma_semaphore, #tpu.memory_space<semaphore_mem>>
      %125 = tpu.memref_squeeze %124 : memref<1x!tpu.dma_semaphore, #tpu.memory_space<semaphore_mem>> -> memref<!tpu.dma_semaphore, #tpu.memory_space<semaphore_mem>>
      tpu.enqueue_dma source(%arg4 : memref<128x128xbf16, #tpu.memory_space<any>>) target(%arg15 : memref<128x128xbf16, #tpu.memory_space<vmem>>) target_semaphore(%125 : memref<!tpu.dma_semaphore, #tpu.memory_space<semaphore_mem>>)
      %c2_i32_43 = arith.constant 2 : i32
      %126 = tpu.memref_slice %arg16[%c2_i32_43] : memref<4x!tpu.dma_semaphore, #tpu.memory_space<semaphore_mem>> -> memref<1x!tpu.dma_semaphore, #tpu.memory_space<semaphore_mem>>
      %127 = tpu.memref_squeeze %126 : memref<1x!tpu.dma_semaphore, #tpu.memory_space<semaphore_mem>> -> memref<!tpu.dma_semaphore, #tpu.memory_space<semaphore_mem>>
      tpu.wait_dma2 semaphore(%127 : memref<!tpu.dma_semaphore, #tpu.memory_space<semaphore_mem>>) src(%arg3 : memref<128x128xbf16, #tpu.memory_space<any>>) dst(%arg14 : memref<128x128xbf16, #tpu.memory_space<vmem>>)
      %c3_i32_44 = arith.constant 3 : i32
      %128 = tpu.memref_slice %arg16[%c3_i32_44] : memref<4x!tpu.dma_semaphore, #tpu.memory_space<semaphore_mem>> -> memref<1x!tpu.dma_semaphore, #tpu.memory_space<semaphore_mem>>
      %129 = tpu.memref_squeeze %128 : memref<1x!tpu.dma_semaphore, #tpu.memory_space<semaphore_mem>> -> memref<!tpu.dma_semaphore, #tpu.memory_space<semaphore_mem>>
      tpu.wait_dma2 semaphore(%129 : memref<!tpu.dma_semaphore, #tpu.memory_space<semaphore_mem>>) src(%arg4 : memref<128x128xbf16, #tpu.memory_space<any>>) dst(%arg15 : memref<128x128xbf16, #tpu.memory_space<vmem>>)
    } else {
    }
    %c16_i32 = arith.constant 16 : i32
    %4 = arith.muli %arg1, %c16_i32 : i32
    %5 = tpu.assume_multiple %4, 8 : i32
    %c0_i32_1 = arith.constant 0 : i32
    %6 = tpu.memref_slice %arg2[%arg0, %5, %c0_i32_1] : memref<2x56x128xf32, #tpu.memory_space<any>> -> memref<1x24x128xf32, #tpu.memory_space<any>>
    %7 = tpu.memref_squeeze %6 : memref<1x24x128xf32, #tpu.memory_space<any>> -> memref<24x128xf32, #tpu.memory_space<any>>
    %c0_i32_2 = arith.constant 0 : i32
    %c0_i32_3 = arith.constant 0 : i32
    %8 = tpu.memref_slice %arg13[%0, %c0_i32_2, %c0_i32_3] : memref<2x24x128xf32, #tpu.memory_space<vmem>> -> memref<1x24x128xf32, #tpu.memory_space<vmem>>
    %9 = tpu.memref_squeeze %8 : memref<1x24x128xf32, #tpu.memory_space<vmem>> -> memref<24x128xf32, #tpu.memory_space<vmem>>
    %10 = tpu.memref_slice %arg16[%0] : memref<4x!tpu.dma_semaphore, #tpu.memory_space<semaphore_mem>> -> memref<1x!tpu.dma_semaphore, #tpu.memory_space<semaphore_mem>>
    %11 = tpu.memref_squeeze %10 : memref<1x!tpu.dma_semaphore, #tpu.memory_space<semaphore_mem>> -> memref<!tpu.dma_semaphore, #tpu.memory_space<semaphore_mem>>
    tpu.wait_dma2 semaphore(%11 : memref<!tpu.dma_semaphore, #tpu.memory_space<semaphore_mem>>) src(%7 : memref<24x128xf32, #tpu.memory_space<any>>) dst(%9 : memref<24x128xf32, #tpu.memory_space<vmem>>)
    %c1_i32 = arith.constant 1 : i32
    %12 = arith.addi %arg1, %c1_i32 : i32
    %c3_i32 = arith.constant 3 : i32
    %13 = arith.cmpi slt, %12, %c3_i32 : i32
    %14 = arith.extui %13 : i1 to i32
    %c0_i32_4 = arith.constant 0 : i32
    %15 = arith.cmpi ne, %14, %c0_i32_4 : i32
    scf.if %15 {
      %c1_i32_37 = arith.constant 1 : i32
      %114 = arith.addi %arg1, %c1_i32_37 : i32
      %c1_i32_38 = arith.constant 1 : i32
      %115 = arith.subi %c1_i32_38, %0 : i32
      %c16_i32_39 = arith.constant 16 : i32
      %116 = arith.muli %114, %c16_i32_39 : i32
      %117 = tpu.assume_multiple %116, 8 : i32
      %c0_i32_40 = arith.constant 0 : i32
      %118 = tpu.memref_slice %arg2[%arg0, %117, %c0_i32_40] : memref<2x56x128xf32, #tpu.memory_space<any>> -> memref<1x24x128xf32, #tpu.memory_space<any>>
      %119 = tpu.memref_squeeze %118 : memref<1x24x128xf32, #tpu.memory_space<any>> -> memref<24x128xf32, #tpu.memory_space<any>>
      %c0_i32_41 = arith.constant 0 : i32
      %c0_i32_42 = arith.constant 0 : i32
      %120 = tpu.memref_slice %arg13[%115, %c0_i32_41, %c0_i32_42] : memref<2x24x128xf32, #tpu.memory_space<vmem>> -> memref<1x24x128xf32, #tpu.memory_space<vmem>>
      %121 = tpu.memref_squeeze %120 : memref<1x24x128xf32, #tpu.memory_space<vmem>> -> memref<24x128xf32, #tpu.memory_space<vmem>>
      %122 = tpu.memref_slice %arg16[%115] : memref<4x!tpu.dma_semaphore, #tpu.memory_space<semaphore_mem>> -> memref<1x!tpu.dma_semaphore, #tpu.memory_space<semaphore_mem>>
      %123 = tpu.memref_squeeze %122 : memref<1x!tpu.dma_semaphore, #tpu.memory_space<semaphore_mem>> -> memref<!tpu.dma_semaphore, #tpu.memory_space<semaphore_mem>>
      tpu.enqueue_dma source(%119 : memref<24x128xf32, #tpu.memory_space<any>>) target(%121 : memref<24x128xf32, #tpu.memory_space<vmem>>) target_semaphore(%123 : memref<!tpu.dma_semaphore, #tpu.memory_space<semaphore_mem>>)
    } else {
    }
    %16 = arith.index_cast %0 : i32 to index
    %c0 = arith.constant 0 : index
    %c0_5 = arith.constant 0 : index
    %17 = vector.load %arg13[%16, %c0, %c0_5] : memref<2x24x128xf32, #tpu.memory_space<vmem>>, vector<1x24x128xf32>
    %18 = vector.shape_cast %17 : vector<1x24x128xf32> to vector<24x128xf32>
    %c0_6 = arith.constant 0 : index
    %c0_7 = arith.constant 0 : index
    %19 = vector.load %arg5[%c0_6, %c0_7] : memref<7x128xf32, #tpu.memory_space<vmem>>, vector<7x128xf32>
    %c0_8 = arith.constant 0 : index
    %c0_9 = arith.constant 0 : index
    %20 = vector.load %arg6[%c0_8, %c0_9] : memref<1x128xf32, #tpu.memory_space<vmem>>, vector<1x128xf32>
    %21 = vector.extract_strided_slice %18 {offsets = [0, 0], sizes = [16, 128], strides = [1, 1]} : vector<24x128xf32> to vector<16x128xf32>
    %22 = vector.extract_strided_slice %19 {offsets = [0, 0], sizes = [1, 128], strides = [1, 1]} : vector<7x128xf32> to vector<1x128xf32>
    %23 = vector.broadcast %22 : vector<1x128xf32> to vector<16x128xf32>
    %24 = arith.mulf %21, %23 : vector<16x128xf32>
    %25 = vector.broadcast %20 : vector<1x128xf32> to vector<16x128xf32>
    %26 = arith.addf %25, %24 : vector<16x128xf32>
    %27 = vector.extract_strided_slice %18 {offsets = [1, 0], sizes = [16, 128], strides = [1, 1]} : vector<24x128xf32> to vector<16x128xf32>
    %28 = vector.extract_strided_slice %19 {offsets = [1, 0], sizes = [1, 128], strides = [1, 1]} : vector<7x128xf32> to vector<1x128xf32>
    %29 = vector.broadcast %28 : vector<1x128xf32> to vector<16x128xf32>
    %30 = arith.mulf %27, %29 : vector<16x128xf32>
    %31 = arith.addf %26, %30 : vector<16x128xf32>
    %32 = vector.extract_strided_slice %18 {offsets = [2, 0], sizes = [16, 128], strides = [1, 1]} : vector<24x128xf32> to vector<16x128xf32>
    %33 = vector.extract_strided_slice %19 {offsets = [2, 0], sizes = [1, 128], strides = [1, 1]} : vector<7x128xf32> to vector<1x128xf32>
    %34 = vector.broadcast %33 : vector<1x128xf32> to vector<16x128xf32>
    %35 = arith.mulf %32, %34 : vector<16x128xf32>
    %36 = arith.addf %31, %35 : vector<16x128xf32>
    %37 = vector.extract_strided_slice %18 {offsets = [3, 0], sizes = [16, 128], strides = [1, 1]} : vector<24x128xf32> to vector<16x128xf32>
    %38 = vector.extract_strided_slice %19 {offsets = [3, 0], sizes = [1, 128], strides = [1, 1]} : vector<7x128xf32> to vector<1x128xf32>
    %39 = vector.broadcast %38 : vector<1x128xf32> to vector<16x128xf32>
    %40 = arith.mulf %37, %39 : vector<16x128xf32>
    %41 = arith.addf %36, %40 : vector<16x128xf32>
    %42 = vector.extract_strided_slice %18 {offsets = [4, 0], sizes = [16, 128], strides = [1, 1]} : vector<24x128xf32> to vector<16x128xf32>
    %43 = vector.extract_strided_slice %19 {offsets = [4, 0], sizes = [1, 128], strides = [1, 1]} : vector<7x128xf32> to vector<1x128xf32>
    %44 = vector.broadcast %43 : vector<1x128xf32> to vector<16x128xf32>
    %45 = arith.mulf %42, %44 : vector<16x128xf32>
    %46 = arith.addf %41, %45 : vector<16x128xf32>
    %47 = vector.extract_strided_slice %18 {offsets = [5, 0], sizes = [16, 128], strides = [1, 1]} : vector<24x128xf32> to vector<16x128xf32>
    %48 = vector.extract_strided_slice %19 {offsets = [5, 0], sizes = [1, 128], strides = [1, 1]} : vector<7x128xf32> to vector<1x128xf32>
    %49 = vector.broadcast %48 : vector<1x128xf32> to vector<16x128xf32>
    %50 = arith.mulf %47, %49 : vector<16x128xf32>
    %51 = arith.addf %46, %50 : vector<16x128xf32>
    %52 = vector.extract_strided_slice %18 {offsets = [6, 0], sizes = [16, 128], strides = [1, 1]} : vector<24x128xf32> to vector<16x128xf32>
    %53 = vector.extract_strided_slice %19 {offsets = [6, 0], sizes = [1, 128], strides = [1, 1]} : vector<7x128xf32> to vector<1x128xf32>
    %54 = vector.broadcast %53 : vector<1x128xf32> to vector<16x128xf32>
    %55 = arith.mulf %52, %54 : vector<16x128xf32>
    %56 = arith.addf %51, %55 : vector<16x128xf32>
    %cst = arith.constant dense<0.000000e+00> : vector<16xf32>
    %57 = vector.multi_reduction <add>, %56, %cst [1] : vector<16x128xf32> to vector<16xf32>
    %58 = vector.shape_cast %57 : vector<16xf32> to vector<16x1xf32>
    %cst_10 = arith.constant 3.125000e-02 : f32
    %59 = vector.broadcast %cst_10 : f32 to vector<16x1xf32>
    %60 = arith.mulf %58, %59 : vector<16x1xf32>
    %61 = vector.broadcast %60 : vector<16x1xf32> to vector<16x128xf32>
    %62 = arith.subf %56, %61 : vector<16x128xf32>
    %63 = tpu.iota {dimensions = array<i32: 1>} : vector<1x128xi32>
    %c32_i32 = arith.constant 32 : i32
    %64 = vector.broadcast %c32_i32 : i32 to vector<1x128xi32>
    %65 = arith.cmpi slt, %63, %64 : vector<1x128xi32>
    %cst_11 = arith.constant 0.000000e+00 : f32
    %66 = vector.shape_cast %65 : vector<1x128xi1> to vector<1x128xi1>
    %67 = vector.broadcast %66 : vector<1x128xi1> to vector<16x128xi1>
    %68 = vector.broadcast %cst_11 : f32 to vector<16x128xf32>
    %69 = arith.select %67, %62, %68 : vector<16x128xi1>, vector<16x128xf32>
    %70 = arith.mulf %69, %69 : vector<16x128xf32>
    %cst_12 = arith.constant dense<0.000000e+00> : vector<16xf32>
    %71 = vector.multi_reduction <add>, %70, %cst_12 [1] : vector<16x128xf32> to vector<16xf32>
    %72 = vector.shape_cast %71 : vector<16xf32> to vector<16x1xf32>
    %cst_13 = arith.constant 3.125000e-02 : f32
    %73 = vector.broadcast %cst_13 : f32 to vector<16x1xf32>
    %74 = arith.mulf %72, %73 : vector<16x1xf32>
    %cst_14 = arith.constant 9.99999997E-7 : f32
    %75 = vector.broadcast %cst_14 : f32 to vector<16x1xf32>
    %76 = arith.addf %74, %75 : vector<16x1xf32>
    %77 = math.rsqrt %76 : vector<16x1xf32>
    %78 = vector.broadcast %77 : vector<16x1xf32> to vector<16x128xf32>
    %79 = arith.mulf %69, %78 : vector<16x128xf32>
    %c0_15 = arith.constant 0 : index
    %c0_16 = arith.constant 0 : index
    %80 = vector.load %arg7[%c0_15, %c0_16] : memref<1x128xf32, #tpu.memory_space<vmem>>, vector<1x128xf32>
    %81 = vector.broadcast %80 : vector<1x128xf32> to vector<16x128xf32>
    %82 = arith.mulf %79, %81 : vector<16x128xf32>
    %c0_17 = arith.constant 0 : index
    %c0_18 = arith.constant 0 : index
    %83 = vector.load %arg8[%c0_17, %c0_18] : memref<1x128xf32, #tpu.memory_space<vmem>>, vector<1x128xf32>
    %84 = vector.broadcast %83 : vector<1x128xf32> to vector<16x128xf32>
    %85 = arith.addf %82, %84 : vector<16x128xf32>
    %86 = arith.truncf %85 : vector<16x128xf32> to vector<16x128xbf16>
    %c0_19 = arith.constant 0 : index
    %c0_20 = arith.constant 0 : index
    %87 = vector.load %arg14[%c0_19, %c0_20] : memref<128x128xbf16, #tpu.memory_space<vmem>>, vector<128x128xbf16>
    %cst_21 = arith.constant dense<0.000000e+00> : vector<16x128xf32>
    %88 = tpu.matmul %86, %87, %cst_21 {dimension_numbers = #tpu.dot_dimension_numbers<[1], [0], [0], [1], [0, 0, 1, 1], [], []>} : vector<16x128xbf16>, vector<128x128xbf16>, vector<16x128xf32> -> vector<16x128xf32>
    %c0_22 = arith.constant 0 : index
    %c0_23 = arith.constant 0 : index
    %89 = vector.load %arg9[%c0_22, %c0_23] : memref<1x128xf32, #tpu.memory_space<vmem>>, vector<1x128xf32>
    %90 = vector.broadcast %89 : vector<1x128xf32> to vector<16x128xf32>
    %91 = arith.addf %88, %90 : vector<16x128xf32>
    %cst_24 = arith.constant 5.000000e-01 : f32
    %92 = vector.broadcast %cst_24 : f32 to vector<16x128xf32>
    %93 = arith.mulf %92, %91 : vector<16x128xf32>
    %cst_25 = arith.constant 0.707106769 : f32
    %94 = vector.broadcast %cst_25 : f32 to vector<16x128xf32>
    %95 = arith.mulf %91, %94 : vector<16x128xf32>
    %96 = math.erf %95 : vector<16x128xf32>
    %cst_26 = arith.constant 1.000000e+00 : f32
    %97 = vector.broadcast %cst_26 : f32 to vector<16x128xf32>
    %98 = arith.addf %97, %96 : vector<16x128xf32>
    %99 = arith.mulf %93, %98 : vector<16x128xf32>
    %100 = arith.truncf %99 : vector<16x128xf32> to vector<16x128xbf16>
    %c0_27 = arith.constant 0 : index
    %c0_28 = arith.constant 0 : index
    %101 = vector.load %arg15[%c0_27, %c0_28] : memref<128x128xbf16, #tpu.memory_space<vmem>>, vector<128x128xbf16>
    %cst_29 = arith.constant dense<0.000000e+00> : vector<16x128xf32>
    %102 = tpu.matmul %100, %101, %cst_29 {dimension_numbers = #tpu.dot_dimension_numbers<[1], [0], [0], [1], [0, 0, 1, 1], [], []>} : vector<16x128xbf16>, vector<128x128xbf16>, vector<16x128xf32> -> vector<16x128xf32>
    %c0_30 = arith.constant 0 : index
    %c0_31 = arith.constant 0 : index
    %103 = vector.load %arg10[%c0_30, %c0_31] : memref<1x128xf32, #tpu.memory_space<vmem>>, vector<1x128xf32>
    %104 = vector.broadcast %103 : vector<1x128xf32> to vector<16x128xf32>
    %105 = arith.addf %102, %104 : vector<16x128xf32>
    %c0_32 = arith.constant 0 : index
    %c0_33 = arith.constant 0 : index
    %106 = vector.load %arg11[%c0_32, %c0_33] : memref<1x128xf32, #tpu.memory_space<vmem>>, vector<1x128xf32>
    %107 = vector.broadcast %106 : vector<1x128xf32> to vector<16x128xf32>
    %108 = arith.mulf %105, %107 : vector<16x128xf32>
    %109 = vector.extract_strided_slice %18 {offsets = [3, 0], sizes = [16, 128], strides = [1, 1]} : vector<24x128xf32> to vector<16x128xf32>
    %110 = arith.addf %108, %109 : vector<16x128xf32>
    %c0_34 = arith.constant 0 : index
    %c0_35 = arith.constant 0 : index
    %c0_36 = arith.constant 0 : index
    %111 = vector.load %arg12[%c0_34, %c0_35, %c0_36] : memref<1x16x128xf32, #tpu.memory_space<vmem>>, vector<1x16x128xf32>
    %112 = vector.shape_cast %111 : vector<1x16x128xf32> to vector<16x128xf32>
    %113 = vector.shape_cast %110 : vector<16x128xf32> to vector<1x16x128xf32>
    tpu.vector_store %arg12[%c0_34, %c0_35, %c0_36], %113 {strides = array<i32>} : memref<1x16x128xf32, #tpu.memory_space<vmem>>, vector<1x16x128xf32>,
    return
  }
  func.func @transform_3(%arg0: i32, %arg1: i32) -> (i32, i32) {
    %c0_i32 = arith.constant 0 : i32
    %c0_i32_0 = arith.constant 0 : i32
    %c0_i32_1 = arith.constant 0 : i32
    return %c0_i32, %c0_i32_0 : i32, i32
  }
  func.func @transform_4(%arg0: i32, %arg1: i32) -> (i32, i32) {
    %c0_i32 = arith.constant 0 : i32
    %c0_i32_0 = arith.constant 0 : i32
    %c0_i32_1 = arith.constant 0 : i32
    return %c0_i32, %c0_i32_0 : i32, i32
  }
  func.func @transform_5(%arg0: i32, %arg1: i32) -> (i32, i32) {
    %c0_i32 = arith.constant 0 : i32
    %c0_i32_0 = arith.constant 0 : i32
    %c0_i32_1 = arith.constant 0 : i32
    return %c0_i32, %c0_i32_0 : i32, i32
  }
  func.func @transform_6(%arg0: i32, %arg1: i32) -> (i32, i32) {
    %c0_i32 = arith.constant 0 : i32
    %c0_i32_0 = arith.constant 0 : i32
    %c0_i32_1 = arith.constant 0 : i32
    return %c0_i32, %c0_i32_0 : i32, i32
  }
  func.func @transform_7(%arg0: i32, %arg1: i32) -> (i32, i32) {
    %c0_i32 = arith.constant 0 : i32
    %c0_i32_0 = arith.constant 0 : i32
    %c0_i32_1 = arith.constant 0 : i32
    return %c0_i32, %c0_i32_0 : i32, i32
  }
  func.func @transform_8(%arg0: i32, %arg1: i32) -> (i32, i32) {
    %c0_i32 = arith.constant 0 : i32
    %c0_i32_0 = arith.constant 0 : i32
    %c0_i32_1 = arith.constant 0 : i32
    return %c0_i32, %c0_i32_0 : i32, i32
  }
  func.func @transform_9(%arg0: i32, %arg1: i32) -> (i32, i32) {
    %c0_i32 = arith.constant 0 : i32
    %c0_i32_0 = arith.constant 0 : i32
    %c0_i32_1 = arith.constant 0 : i32
    return %c0_i32, %c0_i32_0 : i32, i32
  }
  func.func @transform_10(%arg0: i32, %arg1: i32) -> (i32, i32, i32) {
    %c0_i32 = arith.constant 0 : i32
    %c0_i32_0 = arith.constant 0 : i32
    return %arg0, %arg1, %c0_i32 : i32, i32, i32
  }
}

</mosaic_0001>

<bundles_post_ra>
// kernel: tpu_custom_call.1
= control target key start
LH: loop header
LB: loop body
LE: loop exit
PB: predicated region body
PF: predicated region fallthrough
CT: control target
= control target key end

     0   :  { %s1645_s0 = inlined_call_operand.hbm [shape: f32[2,56,128], index: 0, kind: input, shape index: {}]   ;;  %s1646_s1 = inlined_call_operand.hbm [shape: bf16[128,128], index: 1, kind: input, shape index: {}]   ;;  %s1647_s2 = inlined_call_operand.hbm [shape: bf16[128,128], index: 2, kind: input, shape index: {}]   ;;  %s1648_s3 = inlined_call_operand.vmem [shape: f32[7,128], index: 3, kind: input, shape index: {}]   ;;  %s1649_s4 = inlined_call_operand.vmem [shape: f32[1,128], index: 4, kind: input, shape index: {}]   ;;  %s1650_s5 = inlined_call_operand.vmem [shape: f32[1,128], index: 5, kind: input, shape index: {}]   ;;  %s1651_s6 = inlined_call_operand.vmem [shape: f32[1,128], index: 6, kind: input, shape index: {}]   ;;  %s1652_s7 = inlined_call_operand.vmem [shape: f32[1,128], index: 7, kind: input, shape index: {}]   ;;  %s1653_s8 = inlined_call_operand.vmem [shape: f32[1,128], index: 8, kind: input, shape index: {}]   ;;  %s1654_s9 = inlined_call_operand.vmem [shape: f32[1,128], index: 9, kind: input, shape index: {}]   ;;  %s1655_s10 = inlined_call_operand.hbm [shape: f32[2,48,128], index: 10, kind: output, shape index: {}]  }
   0x1   :  { %1672 = sst [smem:[#allocation32_spill]] %s1655_s10 }
   0x2   :  { %15 = vsyncpa [#allocation7], 0 }
   0x3   :  { %17 = vsyncpa [#allocation7 + $0x1], 0  ;;  %s1286_s13 = smov 0   ;;  %s1288_s14 = smov 0  }
   0x4   :  { %s1290_s15 = smov 0   ;;  %s1292_s16 = smov 0  }
   0x5   :  { %s1294_s17 = smov 0   ;;  %s1296_s18 = smov 0  }
   0x6   :  { %s1298_s19 = smov 0   ;;  %s1300_s20 = smov 0  }
   0x7 LB: > { %1673 = sst [smem:[#allocation22_spill]] %s1193_s13  ;;  %s827_s21 = sadd.s32 4294967295, %s1221_s20   ;;  %s1221_s20 = sphi %s1300_s20, %s23_s20   ;;  %s1217_s19 = sphi %s1298_s19, %s1702_s19   ;;  %s1213_s18 = sphi %s1296_s18, %s1701_s18   ;;  %s1209_s17 = sphi %s1294_s17, %s1700_s17   ;;  %s1205_s16 = sphi %s1292_s16, %s1699_s16   ;;  %s1201_s15 = sphi %s1290_s15, %s1698_s15   ;;  %s1197_s14 = sphi %s1288_s14, %s1704_s14   ;;  %s1193_s13 = sphi %s1286_s13, %s1703_s13  }
   0x8   : > { %1674 = sst [smem:[#allocation23_spill]] %s1201_s15  ;;  %s828_s22 = sadd.s32 4294967294, %s1221_s20  }
   0x9   : > { %1675 = sst [smem:[#allocation24_spill]] %s1213_s18  ;;  %s32_s23 = sadd.s32 1, %s1213_s18 }
   0xa   : > { %1676 = sst [smem:[#allocation25_spill]] %s1217_s19  ;;  %p33_p0 = scmp.ge.s32.totalorder %s32_s23, 3 }
   0xb   : > { %1677 = sst [smem:[#allocation26_spill]] %s1221_s20  ;;  %s35_s24 = sadd.s32 1, %s1217_s19 }
   0xc   : > { %p201_p1 = scmp.ne.s32.totalorder %s1201_s15, %s1197_s14  ;;  %p202_p2 = scmp.eq.s32.totalorder %s827_s21, 5 }
   0xd   : > { %s1706_s23 = smov (%p33_p0, %s32_s23), 0  ;;  %s1708_s24 = smov (!%p33_p0, %s35_s24), %s1217_s19 }
   0xe   : > { %1678 = sst [smem:[#allocation27_spill]] %s1706_s23  ;;  %s187_s25 = ssub.s32 %s1213_s18, %s1706_s23 }
   0xf   : > { %p1337_p3 = por %p202_p2, %p201_p1  ;;  %p37_p4 = scmp.ge.s32.totalorder %s1708_s24, 2 }
  0x10   : > { %p207_p5 = scmp.ne.s32.totalorder %s1197_s14, %s1193_s13  ;;  %p208_p6 = scmp.eq.s32.totalorder %s828_s22, 5 }
  0x11   : > { %s1679_s26 = scalar_select %p1337_p3, 1, 0 }
  0x12   : > { %p830_p7 = scmp.ge.s32.totalorder %s1221_s20, 1  ;;  %s1710_s24 = smov (%p37_p4, %s1708_s24), 0 }
  0x13   : > { %1680 = sst [smem:[#allocation28_spill]] %s1679_s26  ;;  %p1346_p8 = por %p208_p6, %p207_p5 }
  0x14   : > { %1681 = sst [smem:[#allocation29_spill]] %s1710_s24  ;;  %p247_p9 = scmp.lt.s32.totalorder %s1221_s20, 7 }
  0x15   : > { %s1682_s27 = scalar_select %p1346_p8, 1, 0 }
  0x16   : > { %s186_s28 = ssub.s32 %s1217_s19, %s1710_s24  ;;  %s191_s29 = sadd.s32 1, %s1201_s15 }
  0x17   : > { %1683 = sst [smem:[#allocation30_spill]] %s1682_s27  ;;  %s188_s30 = sor.u32 %s187_s25, %s186_s28 }
  0x18   : > { %p248_p10 = pnand %p830_p7, %p247_p9  ;;  %p189_p11 = scmp.eq.s32.totalorder %s188_s30, 0 }
  0x19   : > { %s1661_s12 = sand.u32 (!%p248_p10), 1, %s1197_s14   ;;  %p276_p12 = scmp.lt.s32.totalorder (!%p248_p10), %s1205_s16, 0 }
  0x1a   : > { %s1355_s11 = scalar_select %p189_p11, %s1201_s15, %s191_s29  }
  0x1b   : > { %251 = sbr.rel (%p248_p10) target bundleno = 946 (0x3b2), region = 48  ;;  %s1361_s21 = sshll.u32 (!%p248_p10), %s1661_s12, 4 }
  0x1c   : > { %1684 = sst [smem:[#allocation31_spill]] %s1355_s11  ;;  %s277_s22 = ssub.s32 (!%p248_p10), 0, %s1205_s16 }
  0x1d   : > { %s832_s25 = smin.u32 (!%p248_p10), %s1205_s16, %s277_s22  ;;  %p927_p13 = scmp.eq.s32.totalorder (!%p248_p10), %s1205_s16, 0 }
  0x1e   : > { %s279_s28 = sand.u32 (!%p248_p10), 1, %s832_s25   ;;  %s834_s29 = sshll.u32 (!%p248_p10), %s1205_s16, 4 }
  0x1f   : > { %s280_s30 = ssub.s32 (!%p248_p10), 0, %s279_s28  ;;  %s287_s24 = smul.u32 (!%p248_p10), 56, %s1209_s17 }
  0x20   : > { %s1667_s11 = scalar_lea.hbm (!%p248_p10), %s1645_s0, 1792 }
  0x21   : > { %s288_s19 = sadd.s32 (!%p248_p10), %s834_s29, %s287_s24 }
  0x22   : > { %s1712_s30 = smov (!%p276_p12, %s280_s30), %s279_s28  ;;  %s835_s18 = sshll.u32 %s288_s19, 4 }
  0x23   : > { %s291_s23 = smul.u32 24, %s1712_s30  ;;  %s1374_s12 = scalar_lea.hbm %s1645_s0, %s835_s18 }
  0x24   : > { %s1223_s28 = smov [#allocation3]   ;;  %s1384_s24 = scalar_lea.sflag [#allocation5], %s1712_s30 }
  0x25   : > { %s1376_s22 = scalar_lea.vmem [#allocation2], %s291_s23  ;;  %s1381_s27 = sshll.u32 %s1223_s28, 4  ;;  %s314_s27 = int_to_ptr.vmem [resolvable:$true] %s1381_s27 }
  0x26   : > { %s301_s25 = sshll.u32 %s1376_s22, 4  ;;  %s1008_s19 = scalar_lea.hbm %s1374_s12, 384  ;;  %s1379_s25 = int_to_ptr.vmem [resolvable:$true] %s301_s25 }
  0x27   : > { %p1009_p0 = scmp.ne.s32.totalorder %s1374_s12, %s1008_s19  ;;  %p1013_p4 = scmp.lt.u32.totalorder %s1374_s12, %s1645_s0 }
  0x28   : > { %p1014_p5 = scmp.lt.u32.totalorder %s1667_s11, %s1008_s19  ;;  %p1016_p7 = scmp.lt.u32.totalorder %s1008_s19, %s1374_s12 }
  0x29   : > { %p1010_p1 = pnand %p1009_p0, %p927_p13 }
  0x2a   : > { %p1015_p6 = por %p1014_p5, %p1013_p4 }
  0x2b   : > { %p1011_p2 = pneg %p1010_p1 }
  0x2c   : > { %p1017_p9 = por %p1016_p7, %p1015_p6 }
  0x2e   : > { %p1018_p10 = pnand %p1017_p9, %p1011_p2 }
  0x30   : > { %1021 = shalt.err (!%p1018_p10)  }
  0x31   : > { %s1022_s28 = scalar_lea.vmem %s1379_s25, 384  ;;  %s1224_s15 = smov [#allocation2]  }
  0x32   : > { %p1023_p11 = scmp.ne.s32.totalorder %s1379_s25, %s1022_s28  ;;  %s1026_s18 = sshll.u32 %s1224_s15, 4  ;;  %s1406_s18 = int_to_ptr.vmem [resolvable:$false] %s1026_s18 }
  0x33   : > { %s1666_s13 = scalar_lea.vmem %s1406_s18, 768  ;;  %p1029_p1 = scmp.lt.s32.totalorder %s1379_s25, %s1406_s18 }
  0x34   : > { %p1024_p12 = pnand %p1023_p11, %p927_p13  ;;  %p1030_p2 = scmp.lt.s32.totalorder %s1666_s13, %s1022_s28 }
  0x36   : > { %p1025_p0 = pneg %p1024_p12  ;;  %p1031_p4 = por %p1030_p2, %p1029_p1 }
  0x38   : > { %p1032_p5 = pnand %p1031_p4, %p1025_p0 }
  0x3a   : > { %1035 = shalt.err (!%p1032_p5)  }
  0x3b   : > { %914 = dma.hbm_to_vmem [thread:$0]  (%p927_p13), %s1374_s12, 384, %s1379_s25, %s1384_s24 }
  0x3c   : > { %s1036_s23 = scalar_lea.hbm %s1646_s1, 1024 }
  0x3d   : > { %p1037_p6 = scmp.ne.s32.totalorder %s1646_s1, %s1036_s23  ;;  %p1042_p10 = scmp.lt.u32.totalorder %s1036_s23, %s1646_s1 }
  0x3f   : > { %p1038_p7 = pnand %p1037_p6, %p927_p13 }
  0x41   : > { %p1039_p9 = pneg %p1038_p7 }
  0x43   : > { %p1044_p11 = pnand %p1042_p10, %p1039_p9 }
  0x45   : > { %1047 = shalt.err (!%p1044_p11)  }
  0x46   : > { %s1048_s11 = scalar_lea.vmem %s314_s27, 1024  ;;  %p1055_p2 = scmp.lt.s32.totalorder %s314_s27, %s314_s27 }
  0x47   : > { %p1049_p12 = scmp.ne.s32.totalorder %s314_s27, %s1048_s11  ;;  %p1056_p4 = scmp.lt.s32.totalorder %s1048_s11, %s1048_s11 }
  0x49   : > { %p1050_p0 = pnand %p1049_p12, %p927_p13  ;;  %p1057_p5 = por %p1056_p4, %p1055_p2 }
  0x4b   : > { %p1051_p1 = pneg %p1050_p0 }
  0x4d   : > { %p1058_p8 = pnand %p1057_p5, %p1051_p1 }
  0x4f   : > { %1061 = shalt.err (!%p1058_p8)  }
  0x50   : > { %915 = dma.hbm_to_vmem [thread:$0]  (%p927_p13), %s1646_s1, 1024, %s314_s27, [#allocation5 + $0x2] }
  0x51   : > { %s1225_s13 = smov [#allocation4]   ;;  %s1062_s15 = scalar_lea.hbm %s1647_s2, 1024 }
  0x52   : > { %s325_s19 = sshll.u32 %s1225_s13, 4  ;;  %p1063_p6 = scmp.ne.s32.totalorder %s1647_s2, %s1062_s15  ;;  %s326_s19 = int_to_ptr.vmem [resolvable:$true] %s325_s19 }
  0x53   : > { %p1068_p9 = scmp.lt.u32.totalorder %s1062_s15, %s1647_s2 }
  0x54   : > { %p1064_p8 = pnand %p1063_p6, %p927_p13 }
  0x56   : > { %p1065_p7 = pneg %p1064_p8 }
  0x58   : > { %p1070_p10 = pnand %p1068_p9, %p1065_p7 }
  0x5a   : > { %1073 = shalt.err (!%p1070_p10)  }
  0x5b   : > { %s1074_s27 = scalar_lea.vmem %s326_s19, 1024  ;;  %p1081_p1 = scmp.lt.s32.totalorder %s326_s19, %s326_s19 }
  0x5c   : > { %p1075_p11 = scmp.ne.s32.totalorder %s326_s19, %s1074_s27  ;;  %p1082_p2 = scmp.lt.s32.totalorder %s1074_s27, %s1074_s27 }
  0x5e   : > { %p1076_p12 = pnand %p1075_p11, %p927_p13  ;;  %p1083_p4 = por %p1082_p2, %p1081_p1 }
  0x60   : > { %p1077_p0 = pneg %p1076_p12 }
  0x62   : > { %p1084_p5 = pnand %p1083_p4, %p1077_p0 }
  0x64   : > { %1087 = shalt.err (!%p1084_p5)  }
  0x65   : > { %916 = dma.hbm_to_vmem [thread:$0]  (%p927_p13), %s1647_s2, 1024, %s326_s19, [#allocation5 + $0x3] }
  0x66   : > { %s1456_s26 = scalar_lea.vmem [#allocation6], %s1361_s21 }
  0x67   : > { %1178 = dma.done.wait (%p927_p13), [#allocation5 + $0x2], 1024 }
  0x68   : > { %1180 = vsyncadd (%p927_p13), [#allocation5 + $0x2], 4294966272 }
  0x69   : > { %1182 = dma.done.wait (%p927_p13), [#allocation5 + $0x3], 1024 }
  0x6a   : > { %1184 = vsyncadd (%p927_p13), [#allocation5 + $0x3], 4294966272 }
  0x6b   : > { %1185 = dma.done.wait %s1384_s24, 384 }
  0x6c   : > { %1186 = vsyncadd %s1384_s24, 4294966912  ;;  %s342_s21 = sadd.s32 1, %s1205_s16  ;;  %s347_s20 = ssub.s32 1, %s1712_s30  ;;  %v372_v0 = vlaneseq }
  0x6d   : > { %s353_s13 = smul.u32 24, %s347_s20  ;;  %p1470_p6 = scmp.lt.s32.totalorder %s342_s21, 3 }
  0x6e   : > { %s786_s23 = scalar_lea.hbm %s1374_s12, 256  ;;  %v373_v1 = vshrl.u32 %v372_v0, 7  ;;  %s355_s24 = scalar_lea.sflag [#allocation5], %s347_s20 }
  0x6f   : > { %s354_s29 = scalar_lea.vmem [#allocation2], %s353_s13  ;;  %s1116_s28 = scalar_lea.hbm %s1374_s12, 640 }
  0x70   : > { %s363_s15 = sshll.u32 %s354_s29, 4  ;;  %p1089_p13 = scmp.ne.s32.totalorder %s786_s23, %s1116_s28  ;;  %s364_s15 = int_to_ptr.vmem [resolvable:$true] %s363_s15 }
  0x71   : > { %p1093_p9 = scmp.lt.u32.totalorder %s786_s23, %s1645_s0  ;;  %s1686_s25 = scalar_lea.hbm %s1645_s0, 1792 }
  0x72   : > { %p1090_p8 = pnand %p1089_p13, %p1470_p6  ;;  %p1094_p10 = scmp.lt.u32.totalorder %s1686_s25, %s1116_s28 }
  0x73   : > { %p1096_p12 = scmp.lt.u32.totalorder %s1116_s28, %s786_s23 }
  0x74   : > { %p1091_p7 = pneg %p1090_p8  ;;  %p1095_p11 = por %p1094_p10, %p1093_p9 }
  0x76   : > { %p1097_p0 = por %p1096_p12, %p1095_p11 }
  0x78   : > { %p1098_p1 = pnand %p1097_p0, %p1091_p7 }
  0x7a   : > { %1101 = shalt.err (!%p1098_p1)  }
  0x7b   : > { %s1102_s21 = scalar_lea.vmem %s364_s15, 384  ;;  %p1109_p13 = scmp.lt.s32.totalorder %s364_s15, %s1406_s18 }
  0x7c   : > { %p1103_p2 = scmp.ne.s32.totalorder %s364_s15, %s1102_s21  ;;  %s1687_s12 = scalar_lea.vmem %s1406_s18, 768 }
  0x7d   : > { %p1110_p8 = scmp.lt.s32.totalorder %s1687_s12, %s1102_s21 }
  0x7e   : > { %p1104_p4 = pnand %p1103_p2, %p1470_p6 }
  0x7f   : > { %p1111_p3 = por %p1110_p8, %p1109_p13 }
  0x80   : > { %p1105_p5 = pneg %p1104_p4 }
  0x82   : > { %p1112_p9 = pnand %p1111_p3, %p1105_p5 }
  0x84   : > { %1115 = shalt.err (!%p1112_p9)  }
  0x85   : > { %920 = dma.hbm_to_vmem [thread:$0]  (%p1470_p6), %s786_s23, 384, %s364_s15, %s355_s24  ;;  %v374_v2 = vsub.s32 0, %v373_v1  ;;  %v388_v3 = vsub.s32 1, %v373_v1  ;;  %v408_v4 = vsub.s32 2, %v373_v1  ;;  %v370_v5 = vld [vmem:[%s1648_s3] sm:$0x7f] }
  0x86   : > { %v428_v6 = vsub.s32 3, %v373_v1  ;;  %v448_v7 = vsub.s32 4, %v373_v1  ;;  %v468_v8 = vsub.s32 5, %v373_v1  ;;  %v488_v9 = vsub.s32 6, %v373_v1  ;;  %v1497_v15 = vld [vmem:[%s1376_s22] sm:$0xff]  ;;  %v1500_v16 = vld [vmem:[%s1376_s22 + $0x8] sm:$0xff] }
  0x87   : > { %v375_v10 = vrot.slane %v370_v5, %v374_v2  ;;  %v389_v11 = vrot.slane %v370_v5, %v388_v3  ;;  %v409_v12 = vrot.slane %v370_v5, %v408_v4  ;;  %vm396_vm0 = vcmask 1046528   ;;  %v839_v17 = vld [vmem:[%s1649_s4] ss:$0 sm:$0xff]  ;;  %v1515_v36 = vld [vmem:[%s1376_s22 + $0x10] sm:$0xff]  ;;  %s912_s30 = smul.u32 6, %s1209_s17  ;;  %s846_s11 = sshll.u32 %s1205_s16, 1 }
  0x88   : > { %v429_v13 = vrot.slane %v370_v5, %v428_v6  ;;  %v449_v14 = vrot.slane %v370_v5, %v448_v7  ;;  %vm416_vm1 = vcmask 1045504   ;;  %vm436_vm2 = vcmask 1044480   ;;  %s1688_s16 = sld [smem:[#allocation28_spill]]  ;;  %s716_s20 = sshll.u32 %s1456_s26, 4  ;;  %s1587_s20 = int_to_ptr.vmem [resolvable:$true] %s716_s20 }
  0x89   : > { %vm456_vm3 = vcmask 1043456   ;;  %v469_v18 = vrot.slane %v370_v5, %v468_v8  ;;  %vm476_vm4 = vcmask 1042432   ;;  %v489_v19 = vrot.slane %v370_v5, %v488_v9  ;;  %s713_s12 = sadd.s32 %s912_s30, %s846_s11  ;;  %s1689_s19 = sld [smem:[#allocation32_spill]] }
  0x8a   : > { %v376_v20 = vmul.f32 %v375_v10, %v1497_v15  ;;  %v390_v21 = vmul.f32 %v389_v11, %v1497_v15  ;;  %v391_v22 = vmul.f32 %v389_v11, %v1500_v16  ;;  %v410_v23 = vmul.f32 %v409_v12, %v1497_v15  ;;  %s847_s17 = sshll.u32 %s713_s12, 7  ;;  %s1691_s29 = sand.u32 1, %s1197_s14  }
  0x8b   : > { %v411_v24 = vmul.f32 %v409_v12, %v1500_v16  ;;  %v430_v25 = vmul.f32 %v429_v13, %v1497_v15  ;;  %v431_v26 = vmul.f32 %v429_v13, %v1500_v16  ;;  %v450_v27 = vmul.f32 %v449_v14, %v1497_v15  ;;  %s1593_s15 = scalar_lea.sflag [#allocation7], %s1691_s29  ;;  %s1117_s24 = scalar_lea.vmem %s1587_s20, 256 }
  0x8c   : > { %v384_v28 = vadd.f32 %v839_v17, %v376_v20  ;;  %v397_v29 = vrot.slane %v390_v21, 1  ;;  %v398_v30 = vrot.slane %v391_v22, 1  ;;  %v417_v31 = vrot.slane %v410_v23, 2  ;;  %p1118_p3 = scmp.ne.s32.totalorder %s1587_s20, %s1117_s24  ;;  %s1228_s28 = smov [#allocation6]  }
  0x8d   : > { %v418_v32 = vrot.slane %v411_v24, 2  ;;  %v437_v33 = vrot.slane %v430_v25, 3  ;;  %v438_v34 = vrot.slane %v431_v26, 3  ;;  %v451_v35 = vmul.f32 %v449_v14, %v1500_v16  ;;  %v554_v24 = vld [vmem:[#allocation3] sm:$0xff]  ;;  %s1121_s30 = sshll.u32 %s1228_s28, 4  ;;  %s1122_s30 = int_to_ptr.vmem [resolvable:$false] %s1121_s30 }
  0x8e   : > { %v399_v37 = vsel %vm396_vm0, %v397_v29, %v398_v30  ;;  %v457_v38 = vrot.slane %v450_v27, 4  ;;  %v470_v39 = vmul.f32 %v469_v18, %v1497_v15  ;;  %v471_v40 = vmul.f32 %v469_v18, %v1500_v16  ;;  %p1692_p6 = scmp.ne.s32.totalorder %s1688_s16, 0  ;;  %s1123_s11 = scalar_lea.vmem %s1122_s30, 512 }
  0x8f   : > { %v404_v41 = vadd.f32 %v399_v37, %v384_v28  ;;  %v419_v42 = vsel %vm416_vm1, %v417_v31, %v418_v32  ;;  %v439_v43 = vsel %vm436_vm2, %v437_v33, %v438_v34  ;;  %v458_v44 = vrot.slane %v451_v35, 4  ;;  %s1690_s22 = smov %s1689_s19  ;;  %s1585_s23 = scalar_lea.hbm %s1689_s19, %s847_s17 }
  0x90   : > { %v477_v45 = vrot.slane %v470_v39, 5  ;;  %v478_v46 = vrot.slane %v471_v40, 5  ;;  %v490_v47 = vmul.f32 %v489_v19, %v1497_v15  ;;  %v491_v48 = vmul.f32 %v489_v19, %v1500_v16  ;;  %v556_v39 = vld [vmem:[#allocation3 + $0x10] sm:$0xff]  ;;  %v558_v40 = vld [vmem:[#allocation3 + $0x20] sm:$0xff]  ;;  %p1119_p7 = pnand %p1118_p3, %p1692_p6  ;;  %p1124_p11 = scmp.lt.s32.totalorder %s1587_s20, %s1122_s30 }
  0x91   : > { %v424_v49 = vadd.f32 %v419_v42, %v404_v41  ;;  %vm496_vm5 = vcmask 1041408   ;;  %v377_v50 = vmul.f32 %v375_v10, %v1500_v16  ;;  %v392_v51 = vmul.f32 %v389_v11, %v1515_v36  ;;  %v559_v41 = vld [vmem:[#allocation3 + $0x28] sm:$0xff]  ;;  %v560_v42 = vld [vmem:[#allocation3 + $0x30] sm:$0xff]  ;;  %p1125_p12 = scmp.lt.s32.totalorder %s1123_s11, %s1117_s24 }
  0x92   : > { %v459_v52 = vsel %vm456_vm3, %v457_v38, %v458_v44  ;;  %v497_v53 = vrot.slane %v490_v47, 6  ;;  %v498_v54 = vrot.slane %v491_v48, 6  ;;  %v412_v55 = vmul.f32 %v409_v12, %v1515_v36  ;;  %v555_v38 = vld [vmem:[#allocation3 + $0x8] sm:$0xff]  ;;  %p1120_p10 = pneg %p1119_p7 }
  0x93   : > { %v444_v56 = vadd.f32 %v439_v43, %v424_v49  ;;  %v385_v57 = vadd.f32 %v839_v17, %v377_v50  ;;  %v400_v58 = vrot.slane %v392_v51, 1  ;;  %v432_v59 = vmul.f32 %v429_v13, %v1515_v36  ;;  %v561_v43 = vld [vmem:[#allocation3 + $0x38] sm:$0xff]  ;;  %p1126_p0 = por %p1125_p12, %p1124_p11 }
  0x94   : > { %v479_v60 = vsel %vm476_vm4, %v477_v45, %v478_v46  ;;  %v420_v61 = vrot.slane %v412_v55, 2  ;;  %v452_v62 = vmul.f32 %v449_v14, %v1515_v36  ;;  %v472_v63 = vmul.f32 %v469_v18, %v1515_v36  ;;  %v622_v45 = vld [vmem:[#allocation4 + $0x8] sm:$0xff] }
  0x95   : > { %v464_v1 = vadd.f32 %v459_v52, %v444_v56  ;;  %v401_v2 = vsel %vm396_vm0, %v398_v30, %v400_v58  ;;  %v440_v3 = vrot.slane %v432_v59, 3  ;;  %v492_v4 = vmul.f32 %v489_v19, %v1515_v36  ;;  %v841_v58 = vld [vmem:[%s1651_s6] ss:$0 sm:$0xff]  ;;  %p1127_p1 = pnand %p1126_p0, %p1120_p10 }
  0x96   : > { %v499_v5 = vsel %vm496_vm5, %v497_v53, %v498_v54  ;;  %v405_v6 = vadd.f32 %v401_v2, %v385_v57  ;;  %v421_v7 = vsel %vm416_vm1, %v418_v32, %v420_v61  ;;  %v460_v8 = vrot.slane %v452_v62, 4  ;;  %v625_v2 = vld [vmem:[#allocation4 + $0x20] sm:$0xff] }
  0x97   : > { %v484_v9 = vadd.f32 %v479_v60, %v464_v1  ;;  %v441_v10 = vsel %vm436_vm2, %v438_v34, %v440_v3  ;;  %v480_v11 = vrot.slane %v472_v63, 5  ;;  %v500_v17 = vrot.slane %v492_v4, 6  ;;  %v623_v63 = vld [vmem:[#allocation4 + $0x10] sm:$0xff]  ;;  %v624_v1 = vld [vmem:[#allocation4 + $0x18] sm:$0xff]  ;;  %v626_v3 = vld [vmem:[#allocation4 + $0x28] sm:$0xff] }
  0x98   : > { %v425_v12 = vadd.f32 %v421_v7, %v405_v6  ;;  %v461_v14 = vsel %vm456_vm3, %v458_v44, %v460_v8  ;;  %v1226_v25 = vmov 0.0   ;;  %v515_v26 = vand.u32 127, %v372_v0  ;;  %v557_v0 = vld [vmem:[#allocation3 + $0x18] sm:$0xff]  ;;  %v621_v44 = vld [vmem:[#allocation4] sm:$0xff]  ;;  %v627_v4 = vld [vmem:[#allocation4 + $0x30] sm:$0xff] }
  0x99   : > { %v504_v13 = vadd.f32 %v499_v5, %v484_v9  ;;  %v481_v20 = vsel %vm476_vm4, %v478_v46, %v480_v11  ;;  %v501_v21 = vsel %vm496_vm5, %v498_v54, %v500_v17  ;;  %872 = vmatprep.subr.bf16.mxu0 %v1226_v25  ;;  %892 = vmatprep.subr.bf16.mxu1 %v1226_v25  ;;  %vm1227_vm7 = vmmov 0   ;;  %v840_v54 = vld [vmem:[%s1650_s5] ss:$0 sm:$0xff]  ;;  %v628_v5 = vld [vmem:[#allocation4 + $0x38] sm:$0xff] }
  0x9a   : > { %v445_v18 = vadd.f32 %v441_v10, %v425_v12  ;;  %873 = vmatpush3.bf16.msra.mxu0 %v554_v24  ;;  %vm516_vm6 = vcmp.lt.s32.totalorder %v515_v26, 32  ;;  %888 = vmatprep.mubr.msk.bf16.mxu0 %vm1227_vm7, %v1226_v25  ;;  %v842_v6 = vld [vmem:[%s1652_s7] ss:$0 sm:$0xff] }
  0x9b   : > { %506 = vadd.xlane.f32.xlu0 %v504_v13  ;;  %874 = vmatprep.subr.bf16.mxu0 %v1226_v25  ;;  %v843_v26 = vld [vmem:[%s1653_s8] ss:$0 sm:$0xff] }
  0x9c   : > { %v465_v19 = vadd.f32 %v461_v14, %v445_v18  ;;  %908 = vmatprep.mubr.msk.bf16.mxu1 %vm1227_vm7, %v1226_v25  ;;  %893 = vmatpush3.bf16.msra.mxu1 %v621_v44 }
  0x9d   : > { %894 = vmatprep.subr.bf16.mxu1 %v1226_v25 }
  0x9e   : > { %v485_v22 = vadd.f32 %v481_v20, %v465_v19  ;;  %875 = vmatpush3.bf16.msra.mxu0 %v555_v38 }
  0x9f   : > { %876 = vmatprep.subr.bf16.mxu0 %v1226_v25 }
  0xa0   : > { %v505_v23 = vadd.f32 %v501_v21, %v485_v22  ;;  %895 = vmatpush3.bf16.msra.mxu1 %v622_v45 }
  0xa1   : > { %896 = vmatprep.subr.bf16.mxu1 %v1226_v25 }
  0xa2   : > { %508 = vadd.xlane.f32.xlu0 %v505_v23  ;;  %877 = vmatpush3.bf16.msra.mxu0 %v556_v39 }
  0xa3   : > { %878 = vmatprep.subr.bf16.mxu0 %v1226_v25 }
  0xa4   : > { %897 = vmatpush3.bf16.msra.mxu1 %v623_v63 }
  0xa5   : > { %898 = vmatprep.subr.bf16.mxu1 %v1226_v25 }
  0xa6   : > { %879 = vmatpush3.bf16.msra.mxu0 %v557_v0 }
  0xa7   : > { %880 = vmatprep.subr.bf16.mxu0 %v1226_v25 }
  0xa8   : > { %899 = vmatpush3.bf16.msra.mxu1 %v624_v1 }
  0xa9   : > { %900 = vmatprep.subr.bf16.mxu1 %v1226_v25 }
  0xaa   : > { %881 = vmatpush3.bf16.msra.mxu0 %v558_v40 }
  0xab   : > { %882 = vmatprep.subr.bf16.mxu0 %v1226_v25 }
  0xac   : > { %901 = vmatpush3.bf16.msra.mxu1 %v625_v2 }
  0xad   : > { %902 = vmatprep.subr.bf16.mxu1 %v1226_v25 }
  0xae   : > { %883 = vmatpush3.bf16.msra.mxu0 %v559_v41 }
  0xaf   : > { %884 = vmatprep.subr.bf16.mxu0 %v1226_v25 }
  0xb0   : > { %903 = vmatpush3.bf16.msra.mxu1 %v626_v3 }
  0xb1   : > { %904 = vmatprep.subr.bf16.mxu1 %v1226_v25 }
  0xb2   : > { %885 = vmatpush3.bf16.msra.mxu0 %v560_v42 }
  0xb3   : > { %886 = vmatprep.subr.bf16.mxu0 %v1226_v25 }
  0xb4   : > { %905 = vmatpush3.bf16.msra.mxu1 %v627_v4 }
  0xb5   : > { %906 = vmatprep.subr.bf16.mxu1 %v1226_v25 }
  0xb6   : > { %887 = vmatpush3.bf16.msra.mxu0 %v561_v43 }
  0xb8   : > { %907 = vmatpush3.bf16.msra.mxu1 %v628_v5 }
 0x128   : > { %v507_v27 = vpop.xlane.xlu0 %506 }
 0x129   : > { %v510_v28 = vmul.f32 0.03125, %v507_v27  ;;  %v689_v27 = vrot.slane %v1497_v15, 3 }
 0x12b   : > { %v512_v29 = vsub.f32 %v504_v13, %v510_v28  ;;  %v690_v28 = vrot.slane %v1500_v16, 3 }
 0x12d   : > { %v519_v30 = vsel %vm516_vm6, %v512_v29, 0.0 }
 0x12e   : > { %v521_v31 = vmul.f32 %v519_v30, %v519_v30 }
 0x12f   : > { %v509_v32 = vpop.xlane.xlu0 %508 }
 0x130   : > { %v511_v33 = vmul.f32 0.03125, %v509_v32  ;;  %523 = vadd.xlane.f32.xlu1 %v521_v31  ;;  %v692_v31 = vrot.slane %v1515_v36, 3 }
 0x132   : > { %v513_v34 = vsub.f32 %v505_v23, %v511_v33  ;;  %v693_v38 = vsel %vm436_vm2, %v690_v28, %v692_v31 }
 0x134   : > { %v520_v35 = vsel %vm516_vm6, %v513_v34, 0.0  ;;  %v691_v34 = vsel %vm436_vm2, %v689_v27, %v690_v28 }
 0x135   : > { %v522_v37 = vmul.f32 %v520_v35, %v520_v35 }
 0x137   : > { %525 = vadd.xlane.f32.xlu1 %v522_v37 }
 0x1bd   : > { %v524_v46 = vpop.xlane.xlu1 %523 }
 0x1be   : > { %v527_v47 = vmul.f32 0.03125, %v524_v46 }
 0x1c0   : > { %v529_v48 = vadd.f32 1e-06, %v527_v47 }
 0x1c2   : > { %1000 = vrsqrt.f32 %v529_v48 }
 0x1c4   : > { %v526_v49 = vpop.xlane.xlu1 %525 }
 0x1c5   : > { %v528_v50 = vmul.f32 0.03125, %v526_v49 }
 0x1c7   : > { %v530_v51 = vadd.f32 1e-06, %v528_v50 }
 0x1c9   : > { %1002 = vrsqrt.f32 %v530_v51 }
 0x1cc   : > { %v1001_v52 = vpop.eup %1000 }
 0x1cd   : > { %v533_v53 = vmul.f32 %v1001_v52, %v519_v30  ;;  %v844_v30 = vld [vmem:[%s1654_s9] ss:$0 sm:$0xff] }
 0x1cf   : > { %v542_v57 = vmul.f32 %v840_v54, %v533_v53 }
 0x1d1   : > { %v551_v60 = vadd.f32 %v841_v58, %v542_v57 }
 0x1d3   : > { %v1003_v55 = vpop.eup %1002 }
 0x1d4   : > { %v534_v56 = vmul.f32 %v1003_v55, %v520_v35 }
 0x1d6   : > { %v543_v59 = vmul.f32 %v840_v54, %v534_v56 }
 0x1d8   : > { %v552_v61 = vadd.f32 %v841_v58, %v543_v59 }
 0x1da   : > { %v553_v62 = vpack.c.bf16 %v552_v61, %v551_v60 }
 0x1dc   : > { %889 = vmatmul.mubr.bf16.vlgmr.msra.gmra.mrb[0].mxu0 %v553_v62 }
 0x2af   : > { %v603_v7 = vpop.f32.mrb[0].mxu0 }
 0x2b0   : > { %v604_v8 = vadd.f32 %v842_v6, %v603_v7  ;;  %v890_v9 = vpop.f32.mrb[1].mxu0 }
 0x2b1   : > { %v606_v10 = vpop.f32.mrb[2].mxu0 }
 0x2b2   : > { %v612_v11 = vmul.f32 0.70710677, %v604_v8  ;;  %v607_v12 = vadd.f32 %v842_v6, %v606_v10  ;;  %v891_v13 = vpop.f32.mrb[3].mxu0  ;;  %v610_v19 = vmul.f32 0.5, %v604_v8 }
 0x2b4   : > { %1004 = verf.f32 %v612_v11  ;;  %v613_v14 = vmul.f32 0.70710677, %v607_v12  ;;  %v611_v21 = vmul.f32 0.5, %v607_v12 }
 0x2b6   : > { %1006 = verf.f32 %v613_v14 }
 0x2be   : > { %v1005_v17 = vpop.eup %1004 }
 0x2bf   : > { %v616_v18 = vadd.f32 1.0, %v1005_v17 }
 0x2c0   : > { %v1007_v20 = vpop.eup %1006 }
 0x2c1   : > { %v617_v22 = vadd.f32 1.0, %v1007_v20  ;;  %v618_v23 = vmul.f32 %v616_v18, %v610_v19 }
 0x2c3   : > { %v619_v24 = vmul.f32 %v617_v22, %v611_v21 }
 0x2c5   : > { %v620_v25 = vpack.c.bf16 %v619_v24, %v618_v23 }
 0x2c7   : > { %909 = vmatmul.mubr.bf16.vlgmr.msra.gmra.mrb[0].mxu1 %v620_v25 }
 0x39a   : > { %v670_v29 = vpop.f32.mrb[0].mxu1 }
 0x39b   : > { %v671_v32 = vadd.f32 %v843_v26, %v670_v29  ;;  %v910_v33 = vpop.f32.mrb[1].mxu1 }
 0x39c   : > { %v673_v35 = vpop.f32.mrb[2].mxu1 }
 0x39d   : > { %v684_v37 = vmul.f32 %v844_v30, %v671_v32  ;;  %v674_v15 = vadd.f32 %v843_v26, %v673_v35  ;;  %v911_v16 = vpop.f32.mrb[3].mxu1 }
 0x39f   : > { %v696_v39 = vadd.f32 %v691_v34, %v684_v37  ;;  %v685_v0 = vmul.f32 %v844_v30, %v674_v15 }
 0x3a1   : > { %698 = vst [vmem:[%s1456_s26] sm:$0xff] %v696_v39  ;;  %v697_v36 = vadd.f32 %v693_v38, %v685_v0 }
 0x3a3   : > { %699 = vst [vmem:[%s1456_s26 + $0x8] sm:$0xff] %v697_v36 }
 0x3a4   : > { %1130 = shalt.err (!%p1127_p1)
}
 0x3a5   : > { %s1131_s26 = scalar_lea.hbm %s1585_s23, 256  ;;  %s1135_s25 = scalar_lea.hbm %s1690_s22, 1536 }
 0x3a6   : > { %p1132_p2 = scmp.ne.s32.totalorder %s1585_s23, %s1131_s26  ;;  %p1136_p13 = scmp.lt.u32.totalorder %s1585_s23, %s1690_s22 }
 0x3a7   : > { %p1137_p8 = scmp.lt.u32.totalorder %s1135_s25, %s1131_s26  ;;  %p1139_p3 = scmp.lt.u32.totalorder %s1131_s26, %s1585_s23 }
 0x3a8   : > { %p1133_p4 = pnand %p1132_p2, %p1692_p6 }
 0x3a9   : > { %p1138_p9 = por %p1137_p8, %p1136_p13 }
 0x3aa   : > { %p1134_p5 = pneg %p1133_p4 }
 0x3ab   : > { %p1140_p7 = por %p1139_p3, %p1138_p9 }
 0x3ad   : > { %p1141_p10 = pnand %p1140_p7, %p1134_p5 }
 0x3af   : > { %1144 = shalt.err (!%p1141_p10)
}
 0x3b0   : > { %s1229_s17 = smov 128   ;;  %s1230_s13 = smov 8  }
 0x3b1   : > { %921 = dma.vmem_to_hbm [thread:$0]  (%p1692_p6), %s1587_s20, 256, %s1585_s23, %s1593_s15, %s1229_s17, %s1229_s17, %s1230_s13  }
 0x3b2 PF: > { %s1693_s18 = sld [smem:[#allocation26_spill]]  ;;  %s1694_s19 = sld [smem:[#allocation22_spill]] }
 0x3b3   : > { %s1695_s29 = sld [smem:[#allocation30_spill]] }
 0x3b8   : > { %p929_p11 = scmp.ge.s32.totalorder %s1693_s18, 2  ;;  %s731_s24 = sand.u32 1, %s1694_s19  }
 0x3b9   : > { %p1696_p12 = scmp.ne.s32.totalorder %s1695_s29, 0  ;;  %s732_s28 = scalar_lea.sflag [#allocation7], %s731_s24 }
 0x3bb   : > { %p924_p0 = pnand %p929_p11, %p1696_p12 }
 0x3bd   : > { %1188 = dma.done.wait (!%p924_p0), %s732_s28, 256  }
 0x3be   : > { %1190 = vsyncadd (!%p924_p0), %s732_s28, 4294967040  ;;  %s23_s20 = sadd.s32 1, %s1693_s18   ;;  %s1697_s30 = sld [smem:[#allocation23_spill]] }
 0x3bf   : > { %p20_p1 = scmp.ge.s32.totalorder %s23_s20, 8   ;;  %s1698_s15 = sld [smem:[#allocation31_spill]] }
 0x3c0   : > { %s1699_s16 = sld [smem:[#allocation24_spill]]  ;;  %s1700_s17 = sld [smem:[#allocation25_spill]] }
 0x3c1   : > { %s1701_s18 = sld [smem:[#allocation27_spill]]  ;;  %s1702_s19 = sld [smem:[#allocation29_spill]] }
 0x3c2   : > { %s1703_s13 = smov %s1197_s14  ;;  %22 = sbr.rel (!%p20_p1) target bundleno = 7 (0x7), region = 117 }
 0x3c4   : > { %s1704_s14 = smov %s1697_s30 }
 0x3c9   :  { %737 = vsyncpa [#allocation7], 1 }
 0x3ca   :  { %739 = vsyncpa [#allocation7 + $0x1], 1 }
 0x3cb   :  { %740 = vsyncmov [#allocation5] }
 0x3ce   :  { %s741_s23 = vpop.sfrf %740 }
 0x3cf   :  { %p850_p6 = scmp.ne.s32.totalorder %s741_s23, 0 }
 0x3d1   :  { %745 = shalt.err (%p850_p6)  }
 0x3d2   :  { %747 = vsyncmov [#allocation5 + $0x1] }
 0x3d5   :  { %s748_s11 = vpop.sfrf %747 }
 0x3d6   :  { %p851_p2 = scmp.ne.s32.totalorder %s748_s11, 0 }
 0x3d8   :  { %752 = shalt.err (%p851_p2)  }
 0x3d9   :  { %754 = vsyncmov [#allocation5 + $0x2] }
 0x3dc   :  { %s755_s26 = vpop.sfrf %754 }
 0x3dd   :  { %p852_p4 = scmp.ne.s32.totalorder %s755_s26, 0 }
 0x3df   :  { %759 = shalt.err (%p852_p4)  }
 0x3e0   :  { %761 = vsyncmov [#allocation5 + $0x3] }
 0x3e3   :  { %s762_s27 = vpop.sfrf %761 }
 0x3e4   :  { %p853_p5 = scmp.ne.s32.totalorder %s762_s27, 0 }
 0x3e6   :  { %766 = shalt.err (%p853_p5)  }

</bundles_post_ra>
